<compile_context>
chip_gen: v7x
topology: tpu7x:2x2x1
jax: 0.10.0
libtpu: 0.0.40
codegen_flags: <defaults>
</compile_context>

<pallas_src>
import jax
import jax.numpy as jnp
from jax.experimental import pallas as pl
from jax.experimental.pallas import tpu as pltpu


def _eq_kernel(x_ref, y_ref, o_ref):
    # x_ref: (TILE_R, C) int32, y_ref: (1, C) int32 (broadcast across rows).
    # Single fused compare + cast to the output dtype (bool or int8 fallback);
    # trivial VPU work, purely HBM/DMA-bound.
    o_ref[...] = (x_ref[...] == y_ref[...]).astype(o_ref.dtype)


def _choose_tile_rows(rows, cols):
    """Row-tile size: ~8 MiB of int32 x per block (amortizes the ~0.35 us
    per-grid-step overhead on fast-HBM chips), rounded to a multiple of 32
    (int8/bool sublane packing), and capped so the grid keeps >= ~8 steps
    when rows allow (pipelining + both v7x TensorCores)."""
    budget_bytes = 8 * 1024 * 1024           # int32 x block budget
    t = (budget_bytes // (4 * cols)) // 32 * 32
    t = max(32, t)

    min_steps = 8                             # keep the grid from collapsing
    cap = -(-rows // min_steps)               # ceil(rows / min_steps)
    cap = -(-cap // 32) * 32                  # round up to 32
    t = min(t, max(32, cap))

    t = min(t, rows)                          # block == full dim is always legal
    return t


def _build_call(rows, cols, tile_r, out_dtype):
    grid = (pl.cdiv(rows, tile_r),)           # Pallas handles the ragged last tile
    out_bytes = rows * cols * jnp.dtype(out_dtype).itemsize
    return pl.pallas_call(
        _eq_kernel,
        out_shape=jax.ShapeDtypeStruct((rows, cols), out_dtype),
        grid=grid,
        in_specs=[
            pl.BlockSpec((tile_r, cols), lambda i: (i, 0)),  # x: row tiles
            pl.BlockSpec((1, cols), lambda i: (0, 0)),       # y: same block each step
        ],
        out_specs=pl.BlockSpec((tile_r, cols), lambda i: (i, 0)),
        compiler_params=pltpu.CompilerParams(
            dimension_semantics=("parallel",),
            # 2 x 8 MiB x + 2 x (tile_r*cols) out + tiny y ~= 20 MiB; 32 MiB
            # fits v5e/v6e/v7x (v5e's 16 MiB default would otherwise OOM).
            vmem_limit_bytes=32 * 1024 * 1024,
        ),
        cost_estimate=pl.CostEstimate(
            flops=rows * cols,
            transcendentals=0,
            bytes_accessed=4 * rows * cols + 4 * cols + out_bytes,
        ),
    )


def eq_int_tensor(x, y):
    """out = (x == y[None, :]) as bool, mirroring torch.eq(x_2d_int, y_1d_int)."""
    assert x.ndim == 2, "module is annotated for 2-D x"
    assert y.ndim == 1, "module is annotated for 1-D y"
    rows, cols = x.shape
    assert y.shape[0] == cols, "y broadcasts along the last dim of x"
    # TODO(synk): if cols is not a multiple of 128, a lane-padded layout would
    # avoid masked vst.msk partial stores; full-col blocks stay correct anyway.

    y2 = y.reshape(1, cols)                   # 2-D layout for a clean (1, C) block
    tile_r = _choose_tile_rows(rows, cols)

    try:
        # Preferred path: bool written directly from the kernel (single HBM pass).
        return _build_call(rows, cols, tile_r, jnp.bool_)(x, y2)
    except Exception:
        # Fallback: int8 store in-kernel, cheap cast outside (extra HBM pass,
        # but guaranteed to lower on every Mosaic generation).
        out_i8 = _build_call(rows, cols, tile_r, jnp.int8)(x, y2)
        return out_i8.astype(jnp.bool_)


if __name__ == "__main__":
    key = jax.random.PRNGKey(0)
    kx, ky = jax.random.split(key)

    # Small 2-D / 1-D integer inputs consistent with the e2e test; a narrow
    # value range guarantees plenty of equal and unequal positions.
    rows, cols = 64, 128
    x = jax.random.randint(kx, (rows, cols), minval=0, maxval=5, dtype=jnp.int32)
    y = jax.random.randint(ky, (cols,), minval=0, maxval=5, dtype=jnp.int32)

    out = eq_int_tensor(x, y)
    out = jax.block_until_ready(out)

    # Correctness check against plain JAX reference.
    ref = x == y[None, :]
    assert out.dtype == jnp.bool_
    assert out.shape == (rows, cols)
    assert jnp.array_equal(out, ref)

    print("KERNEL_OK")
</pallas_src>

<mosaic_0001>
module attributes {stable_mosaic.version = 11 : i64} {
  func.func @_eq_kernel(%arg0: i32, %arg1: memref<32x128xi32, #tpu.memory_space<vmem>>, %arg2: memref<1x128xi32, #tpu.memory_space<vmem>>, %arg3: memref<32x128xi32, #tpu.memory_space<vmem>>) attributes {dimension_semantics = [#tpu.dimension_semantics<parallel>], iteration_bounds = array<i64: 2>, scalar_prefetch = 0 : i64, scratch_operands = 0 : i64, tpu.core_type = #tpu.core_type<tc>, window_params = [{transform_indices = @transform_0, window_bounds = array<i64: 32, 128>}, {pipeline_mode = #tpu.pipeline_mode<synchronous>, transform_indices = @transform_1, window_bounds = array<i64: 1, 128>}, {transform_indices = @transform_2, window_bounds = array<i64: 32, 128>}]} {
    %c0 = arith.constant 0 : index
    %c0_0 = arith.constant 0 : index
    %0 = vector.load %arg1[%c0, %c0_0] : memref<32x128xi32, #tpu.memory_space<vmem>>, vector<32x128xi32>
    %c0_1 = arith.constant 0 : index
    %c0_2 = arith.constant 0 : index
    %1 = vector.load %arg2[%c0_1, %c0_2] : memref<1x128xi32, #tpu.memory_space<vmem>>, vector<1x128xi32>
    %2 = vector.broadcast %1 : vector<1x128xi32> to vector<32x128xi32>
    %3 = arith.cmpi eq, %0, %2 : vector<32x128xi32>
    %c0_3 = arith.constant 0 : index
    %c0_4 = arith.constant 0 : index
    %4 = vector.load %arg3[%c0_3, %c0_4] : memref<32x128xi32, #tpu.memory_space<vmem>>, vector<32x128xi32>
    %5 = arith.extui %3 : vector<32x128xi1> to vector<32x128xi32>
    %cst = arith.constant dense<0> : vector<32x128xi32>
    %6 = arith.cmpi ne, %4, %cst : vector<32x128xi32>
    tpu.vector_store %arg3[%c0_3, %c0_4], %5 {strides = array<i32>} : memref<32x128xi32, #tpu.memory_space<vmem>>, vector<32x128xi32>,
    return
  }
  func.func @transform_0(%arg0: i32) -> (i32, i32) {
    %c0_i32 = arith.constant 0 : i32
    %c0_i32_0 = arith.constant 0 : i32
    return %arg0, %c0_i32 : i32, i32
  }
  func.func @transform_1(%arg0: i32) -> (i32, i32) {
    %c0_i32 = arith.constant 0 : i32
    %c0_i32_0 = arith.constant 0 : i32
    %c0_i32_1 = arith.constant 0 : i32
    return %c0_i32, %c0_i32_0 : i32, i32
  }
  func.func @transform_2(%arg0: i32) -> (i32, i32) {
    %c0_i32 = arith.constant 0 : i32
    %c0_i32_0 = arith.constant 0 : i32
    return %arg0, %c0_i32 : i32, i32
  }
}

module attributes {stable_mosaic.version = 11 : i64} {
  func.func @_eq_kernel(%arg0: i32, %arg1: memref<32x128xi32, #tpu.memory_space<vmem>>, %arg2: memref<1x128xi32, #tpu.memory_space<vmem>>, %arg3: memref<32x128xi8, #tpu.memory_space<vmem>>) attributes {dimension_semantics = [#tpu.dimension_semantics<parallel>], iteration_bounds = array<i64: 2>, scalar_prefetch = 0 : i64, scratch_operands = 0 : i64, tpu.core_type = #tpu.core_type<tc>, window_params = [{transform_indices = @transform_0, window_bounds = array<i64: 32, 128>}, {pipeline_mode = #tpu.pipeline_mode<synchronous>, transform_indices = @transform_1, window_bounds = array<i64: 1, 128>}, {transform_indices = @transform_2, window_bounds = array<i64: 32, 128>}]} {
    %c0 = arith.constant 0 : index
    %c0_0 = arith.constant 0 : index
    %0 = vector.load %arg1[%c0, %c0_0] : memref<32x128xi32, #tpu.memory_space<vmem>>, vector<32x128xi32>
    %c0_1 = arith.constant 0 : index
    %c0_2 = arith.constant 0 : index
    %1 = vector.load %arg2[%c0_1, %c0_2] : memref<1x128xi32, #tpu.memory_space<vmem>>, vector<1x128xi32>
    %2 = vector.broadcast %1 : vector<1x128xi32> to vector<32x128xi32>
    %3 = arith.cmpi eq, %0, %2 : vector<32x128xi32>
    %4 = arith.extui %3 : vector<32x128xi1> to vector<32x128xi8>
    %c0_3 = arith.constant 0 : index
    %c0_4 = arith.constant 0 : index
    %5 = vector.load %arg3[%c0_3, %c0_4] : memref<32x128xi8, #tpu.memory_space<vmem>>, vector<32x128xi8>
    tpu.vector_store %arg3[%c0_3, %c0_4], %4 {strides = array<i32>} : memref<32x128xi8, #tpu.memory_space<vmem>>, vector<32x128xi8>,
    return
  }
  func.func @transform_0(%arg0: i32) -> (i32, i32) {
    %c0_i32 = arith.constant 0 : i32
    %c0_i32_0 = arith.constant 0 : i32
    return %arg0, %c0_i32 : i32, i32
  }
  func.func @transform_1(%arg0: i32) -> (i32, i32) {
    %c0_i32 = arith.constant 0 : i32
    %c0_i32_0 = arith.constant 0 : i32
    %c0_i32_1 = arith.constant 0 : i32
    return %c0_i32, %c0_i32_0 : i32, i32
  }
  func.func @transform_2(%arg0: i32) -> (i32, i32) {
    %c0_i32 = arith.constant 0 : i32
    %c0_i32_0 = arith.constant 0 : i32
    return %arg0, %c0_i32 : i32, i32
  }
}

</mosaic_0001>

<bundles_post_ra>
// kernel: tpu_custom_call.1
= control target key start
LH: loop header
LB: loop body
LE: loop exit
PB: predicated region body
PF: predicated region fallthrough
CT: control target
= control target key end

     0   :  { %7 = vsyncpa [#allocation3], 0  ;;  %s506_s0 = inlined_call_operand.hbm [shape: s32[64,128], index: 0, kind: input, shape index: {}]   ;;  %s507_s1 = inlined_call_operand.vmem [shape: s32[1,128], index: 1, kind: input, shape index: {}]   ;;  %s508_s2 = inlined_call_operand.vmem [shape: s32[64,128], index: 2, kind: output, shape index: {}]  }
   0x1   :  { %9 = vsyncpa [#allocation3 + $0x1], 0  ;;  %s396_s9 = smov 0   ;;  %s398_s10 = smov 0  }
   0x2   :  { %s400_s11 = smov 0   ;;  %s402_s12 = smov 0  }
   0x3 LB: > { %s254_s13 = sadd.s32 4294967295, %s375_s12   ;;  %s416_s14 = sadd.s32 1, %s375_s12   ;;  %s375_s12 = sphi %s402_s12, %s515_s12   ;;  %s371_s11 = sphi %s400_s11, %s514_s11   ;;  %s367_s10 = sphi %s398_s10, %s513_s10   ;;  %s363_s9 = sphi %s396_s9, %s512_s9  }
   0x4   : > { %s19_s15 = ssub.s32 %s375_s12, %s416_s14  ;;  %s22_s16 = sadd.s32 1, %s371_s11 }
   0x5   : > { %p20_p0 = scmp.eq.s32.totalorder %s19_s15, 0  ;;  %p29_p1 = scmp.ne.s32.totalorder %s371_s11, %s367_s10 }
   0x6   : > { %p30_p2 = scmp.eq.s32.totalorder %s375_s12, 0  ;;  %p35_p3 = scmp.ne.s32.totalorder %s367_s10, %s363_s9 }
   0x7   : > { %s426_s17 = scalar_select %p20_p0, %s371_s11, %s22_s16  }
   0x8   : > { %p31_p4 = por %p30_p2, %p29_p1  ;;  %p36_p5 = scmp.eq.s32.totalorder %s254_s13, 0 }
   0x9   : > { %p275_p6 = scmp.lt.s32.totalorder %s375_s12, 2  ;;  %s109_s19 = sand.u32 1, %s371_s11  }
   0xa   : > { %p431_p7 = por %p36_p5, %p35_p3  ;;  %s258_s20 = sshll.u32 %s109_s19, 5 }
   0xb   : > { %s268_s21 = sshll.u32 %s375_s12, 9  ;;  %s113_s25 = scalar_lea.vmem [#allocation2], %s258_s20 }
   0xc   : > { %s440_s24 = scalar_lea.hbm %s506_s0, %s268_s21  ;;  %s120_s26 = sshll.u32 %s113_s25, 4  ;;  %s442_s26 = int_to_ptr.vmem [resolvable:$true] %s120_s26 }
   0xd   : > { %p444_p8 = pnand %p275_p6, %p31_p4  ;;  %s449_s28 = scalar_lea.sflag [#allocation3], %s109_s19 }
   0xe   : > { %s311_s29 = scalar_lea.hbm %s440_s24, 512  ;;  %s316_s4 = scalar_lea.hbm %s506_s0, 1024 }
   0xf   : > { %p312_p10 = scmp.ne.s32.totalorder %s440_s24, %s311_s29  ;;  %p313_p11 = pneg %p444_p8 }
  0x10   : > { %p317_p0 = scmp.lt.u32.totalorder %s440_s24, %s506_s0  ;;  %p318_p1 = scmp.lt.u32.totalorder %s316_s4, %s311_s29 }
  0x11   : > { %p314_p12 = pnand %p313_p11, %p312_p10  ;;  %p320_p3 = scmp.lt.u32.totalorder %s311_s29, %s440_s24 }
  0x12   : > { %p319_p2 = por %p318_p1, %p317_p0 }
  0x13   : > { %p315_p13 = pneg %p314_p12 }
  0x14   : > { %p321_p4 = por %p320_p3, %p319_p2 }
  0x16   : > { %p322_p5 = pnand %p321_p4, %p315_p13 }
  0x18   : > { %325 = shalt.err (!%p322_p5)
}
  0x19   : > { %s326_s7 = scalar_lea.vmem %s442_s26, 512  ;;  %s377_s8 = smov [#allocation2]  }
  0x1a   : > { %p327_p6 = scmp.ne.s32.totalorder %s442_s26, %s326_s7  ;;  %s331_s9 = sshll.u32 %s377_s8, 4  ;;  %s332_s9 = int_to_ptr.vmem [resolvable:$false] %s331_s9 }
  0x1b   : > { %s333_s15 = scalar_lea.vmem %s332_s9, 1024  ;;  %p334_p9 = scmp.lt.s32.totalorder %s442_s26, %s332_s9 }
  0x1c   : > { %p329_p10 = pnand %p327_p6, %p313_p11  ;;  %p335_p0 = scmp.lt.s32.totalorder %s333_s15, %s326_s7 }
  0x1e   : > { %p330_p12 = pneg %p329_p10  ;;  %p336_p1 = por %p335_p0, %p334_p9 }
  0x20   : > { %p337_p2 = pnand %p336_p1, %p330_p12 }
  0x22   : > { %340 = shalt.err (!%p337_p2)
}
  0x23   : > { %s378_s16 = smov 128   ;;  %s379_s19 = smov 8  }
  0x24   : > { %274 = dma.hbm_to_vmem [thread:$0]  (!%p444_p8), %s440_s24, 512, %s442_s26, %s449_s28, %s378_s16, %s378_s16, %s379_s19  }
  0x25   : > { %p128_p11 = scmp.lt.s32.totalorder %s375_s12, 3  ;;  %p511_p13 = scmp.ge.s32.totalorder %s375_s12, 1 }
  0x27   : > { %p129_p3 = pnand %p511_p13, %p128_p11 }
  0x28   : > { %s134_s20 = sand.u32 (!%p129_p3), 1, %s367_s10  }
  0x29   : > { %132 = sbr.rel (%p129_p3) target bundleno = 57 (0x39), region = 28  ;;  %s262_s21 = sshll.u32 (!%p129_p3), %s134_s20, 5 }
  0x2a   : > { %s135_s22 = scalar_lea.sflag (!%p129_p3), [#allocation3], %s134_s20  ;;  %s138_s23 = scalar_lea.vmem (!%p129_p3), [#allocation2], %s262_s21 }
  0x30   : > { %358 = dma.done.wait (%p431_p7), %s135_s22, 512  }
  0x31   : > { %360 = vsyncadd (%p431_p7), %s135_s22, 4294966784  ;;  %s263_s25 = sshll.u32 %s254_s13, 2  ;;  %v166_v0 = vld [vmem:[%s138_s23] sm:$0xff]  ;;  %v167_v2 = vld [vmem:[%s138_s23 + $0x8] sm:$0xff]  ;;  %v380_v5 = vmov 0  }
  0x32   : > { %p161_p9 = scmp.lt.s32.totalorder %s263_s25, 7  ;;  %v265_v1 = vld [vmem:[%s507_s1] ss:$0 sm:$0xff]  ;;  %v168_v3 = vld [vmem:[%s138_s23 + $0x10] sm:$0xff]  ;;  %v169_v4 = vld [vmem:[%s138_s23 + $0x18] sm:$0xff] }
  0x33   : > { %vm175_vm0 = vcmp.eq.s32.totalorder %v166_v0, %v265_v1  ;;  %vm176_vm1 = vcmp.eq.s32.totalorder %v167_v2, %v265_v1  ;;  %vm177_vm2 = vcmp.eq.s32.totalorder %v168_v3, %v265_v1  ;;  %vm178_vm3 = vcmp.eq.s32.totalorder %v169_v4, %v265_v1 }
  0x34   : > { %s517_s25 = smov (!%p161_p9, %s263_s25), 7  ;;  %v179_v6 = vsel %vm175_vm0, 1, %v380_v5  ;;  %v180_v7 = vsel %vm176_vm1, 1, %v380_v5  ;;  %v181_v8 = vsel %vm177_vm2, 1, %v380_v5  ;;  %v182_v9 = vsel %vm178_vm3, 1, %v380_v5 }
  0x35   : > { %s264_s24 = sshll.u32 %s517_s25, 3 }
  0x36   : > { %s164_s28 = scalar_lea.vmem %s508_s2, %s264_s24 }
  0x37   : > { %183 = vst [vmem:[%s164_s28] sm:$0xff] %v179_v6  ;;  %184 = vst [vmem:[%s164_s28 + $0x8] sm:$0xff] %v180_v7 }
  0x38   : > { %185 = vst [vmem:[%s164_s28 + $0x10] sm:$0xff] %v181_v8  ;;  %186 = vst [vmem:[%s164_s28 + $0x18] sm:$0xff] %v182_v9 }
  0x39 PF: > { %p12_p7 = scmp.ge.s32.totalorder %s416_s14, 4   ;;  %s512_s9 = smov %s367_s10 }
  0x3a   : > { %s513_s10 = smov %s371_s11  ;;  %s514_s11 = smov %s426_s17 }
  0x3b   : > { %s515_s12 = smov %s416_s14  ;;  %14 = sbr.rel (!%p12_p7) target bundleno = 3 (0x3), region = 68 }
  0x42   :  { %209 = vsyncpa [#allocation3], 1 }
  0x43   :  { %211 = vsyncpa [#allocation3 + $0x1], 1 }

// kernel: tpu_custom_call.1
= control target key start
LH: loop header
LB: loop body
LE: loop exit
PB: predicated region body
PF: predicated region fallthrough
CT: control target
= control target key end

     0   :  { %7 = vsyncpa [#allocation3], 0  ;;  %s613_s0 = inlined_call_operand.hbm [shape: s32[64,128], index: 0, kind: input, shape index: {}]   ;;  %s614_s1 = inlined_call_operand.vmem [shape: s32[1,128], index: 1, kind: input, shape index: {}]   ;;  %s615_s2 = inlined_call_operand.hbm [shape: s8[64,128], index: 2, kind: output, shape index: {}]  }
   0x1   :  { %9 = vsyncpa [#allocation3 + $0x1], 0 }
   0x2   :  { %10 = vsyncpa [#allocation4], 0 }
   0x3   :  { %12 = vsyncpa [#allocation4 + $0x1], 0  ;;  %s449_s9 = smov 0   ;;  %s451_s10 = smov 0  }
   0x4   :  { %s453_s11 = smov 0   ;;  %s455_s12 = smov 0  }
   0x5 LB: > { %s470_s13 = sadd.s32 4294967295, %s427_s12   ;;  %s267_s14 = sadd.s32 4294967294, %s427_s12   ;;  %s427_s12 = sphi %s455_s12, %s628_s12   ;;  %s423_s11 = sphi %s453_s11, %s627_s11   ;;  %s419_s10 = sphi %s451_s10, %s626_s10   ;;  %s415_s9 = sphi %s449_s9, %s625_s9  }
   0x6   : > { %s474_s15 = sadd.s32 1, %s427_s12   ;;  %s25_s16 = sadd.s32 1, %s423_s11 }
   0x7   : > { %s22_s17 = ssub.s32 %s427_s12, %s474_s15  ;;  %p32_p0 = scmp.ne.s32.totalorder %s423_s11, %s419_s10 }
   0x8   : > { %p23_p1 = scmp.eq.s32.totalorder %s22_s17, 0  ;;  %p33_p2 = scmp.eq.s32.totalorder %s427_s12, 0 }
   0x9   : > { %p38_p3 = scmp.ne.s32.totalorder %s419_s10, %s415_s9  ;;  %p39_p4 = scmp.eq.s32.totalorder %s470_s13, 0 }
   0xa   : > { %s486_s18 = scalar_select %p23_p1, %s423_s11, %s25_s16  }
   0xb   : > { %p488_p5 = por %p33_p2, %p32_p0  ;;  %p492_p6 = por %p39_p4, %p38_p3 }
   0xc   : > { %p83_p7 = scmp.eq.s32.totalorder %s470_s13, 1  ;;  %p89_p8 = scmp.eq.s32.totalorder %s267_s14, 1 }
   0xd   : > { %p294_p10 = scmp.lt.s32.totalorder %s427_s12, 2  ;;  %s112_s23 = sand.u32 1, %s423_s11  }
   0xe   : > { %p499_p11 = por %p83_p7, %p32_p0  ;;  %p503_p12 = por %p89_p8, %p38_p3 }
   0xf   : > { %s281_s24 = sshll.u32 %s427_s12, 9  ;;  %s270_s25 = sshll.u32 %s112_s23, 5 }
  0x10   : > { %s619_s21 = scalar_select %p499_p11, 1, 0 }
  0x11   : > { %s620_s22 = scalar_select %p503_p12, 1, 0 }
  0x12   : > { %s512_s28 = scalar_lea.hbm %s613_s0, %s281_s24  ;;  %s116_s29 = scalar_lea.vmem [#allocation2], %s270_s25 }
  0x13   : > { %s123_s30 = sshll.u32 %s116_s29, 4  ;;  %p516_p13 = pnand %p294_p10, %p488_p5  ;;  %s520_s30 = int_to_ptr.vmem [resolvable:$true] %s123_s30 }
  0x14   : > { %s522_s4 = scalar_lea.sflag [#allocation3], %s112_s23  ;;  %s331_s5 = scalar_lea.hbm %s512_s28, 512 }
  0x15   : > { %p332_p0 = scmp.ne.s32.totalorder %s512_s28, %s331_s5  ;;  %p333_p1 = pneg %p516_p13 }
  0x16   : > { %s336_s8 = scalar_lea.hbm %s613_s0, 1024  ;;  %p337_p4 = scmp.lt.u32.totalorder %s512_s28, %s613_s0 }
  0x17   : > { %p334_p2 = pnand %p333_p1, %p332_p0  ;;  %p338_p5 = scmp.lt.u32.totalorder %s336_s8, %s331_s5 }
  0x18   : > { %p340_p8 = scmp.lt.u32.totalorder %s331_s5, %s512_s28 }
  0x19   : > { %p335_p3 = pneg %p334_p2  ;;  %p339_p7 = por %p338_p5, %p337_p4 }
  0x1b   : > { %p341_p10 = por %p340_p8, %p339_p7 }
  0x1d   : > { %p342_p9 = pnand %p341_p10, %p335_p3 }
  0x1f   : > { %345 = shalt.err (!%p342_p9)
}
  0x20   : > { %s346_s17 = scalar_lea.vmem %s520_s30, 512  ;;  %s429_s19 = smov [#allocation2]  }
  0x21   : > { %p347_p0 = scmp.ne.s32.totalorder %s520_s30, %s346_s17  ;;  %s351_s23 = sshll.u32 %s429_s19, 4  ;;  %s352_s23 = int_to_ptr.vmem [resolvable:$false] %s351_s23 }
  0x22   : > { %s353_s24 = scalar_lea.vmem %s352_s23, 1024  ;;  %p354_p11 = scmp.lt.s32.totalorder %s520_s30, %s352_s23 }
  0x23   : > { %p349_p2 = pnand %p347_p0, %p333_p1  ;;  %p355_p4 = scmp.lt.s32.totalorder %s353_s24, %s346_s17 }
  0x25   : > { %p350_p12 = pneg %p349_p2  ;;  %p356_p5 = por %p355_p4, %p354_p11 }
  0x27   : > { %p357_p7 = pnand %p356_p5, %p350_p12 }
  0x29   : > { %360 = shalt.err (!%p357_p7)
}
  0x2a   : > { %s430_s25 = smov 128   ;;  %s431_s26 = smov 8  }
  0x2b   : > { %289 = dma.hbm_to_vmem [thread:$0]  (!%p516_p13), %s512_s28, 512, %s520_s30, %s522_s4, %s430_s25, %s430_s25, %s431_s26  }
  0x2c   : > { %p273_p9 = scmp.ge.s32.totalorder %s427_s12, 1  ;;  %p131_p1 = scmp.lt.s32.totalorder %s427_s12, 3 }
  0x2e   : > { %p132_p3 = pnand %p273_p9, %p131_p1 }
  0x2f   : > { %s553_s27 = sand.u32 (!%p132_p3), 1, %s419_s10  }
  0x30   : > { %135 = sbr.rel (%p132_p3) target bundleno = 82 (0x52), region = 28  ;;  %s274_s29 = sshll.u32 (!%p132_p3), %s553_s27, 5 }
  0x31   : > { %s138_s5 = scalar_lea.sflag (!%p132_p3), [#allocation3], %s553_s27  ;;  %s141_s6 = scalar_lea.vmem (!%p132_p3), [#allocation2], %s274_s29 }
  0x37   : > { %406 = dma.done.wait (%p492_p6), %s138_s5, 512  }
  0x38   : > { %408 = vsyncadd (%p492_p6), %s138_s5, 4294966784  ;;  %s275_s28 = sshll.u32 %s553_s27, 3  ;;  %v165_v0 = vld [vmem:[%s141_s6] sm:$0xff]  ;;  %v166_v1 = vld [vmem:[%s141_s6 + $0x8] sm:$0xff]  ;;  %s278_s7 = sshll.u32 %s470_s13, 7  ;;  %v432_v5 = vmov 0  }
  0x39   : > { %v167_v2 = vld [vmem:[%s141_s6 + $0x10] sm:$0xff]  ;;  %v168_v3 = vld [vmem:[%s141_s6 + $0x18] sm:$0xff]  ;;  %v276_v4 = vld [vmem:[%s614_s1] ss:$0 sm:$0xff]  ;;  %s161_s4 = scalar_lea.vmem [#allocation5], %s275_s28  ;;  %s571_s16 = scalar_lea.hbm %s615_s2, %s278_s7 }
  0x3a   : > { %vm174_vm0 = vcmp.eq.s32.totalorder %v165_v0, %v276_v4  ;;  %vm175_vm1 = vcmp.eq.s32.totalorder %v166_v1, %v276_v4  ;;  %vm176_vm2 = vcmp.eq.s32.totalorder %v167_v2, %v276_v4  ;;  %vm177_vm3 = vcmp.eq.s32.totalorder %v168_v3, %v276_v4  ;;  %s197_s20 = sshll.u32 %s161_s4, 4  ;;  %s184_s17 = scalar_lea.sflag [#allocation4], %s553_s27  ;;  %s566_s20 = int_to_ptr.vmem [resolvable:$true] %s197_s20 }
  0x3b   : > { %vm178_vm4 = vmpackc.low %vm175_vm1, %vm174_vm0  ;;  %s361_s19 = scalar_lea.vmem %s566_s20, 128  ;;  %p622_p11 = scmp.ne.s32.totalorder %s619_s21, 0 }
  0x3c   : > { %vm179_vm5 = vmpackc.low %vm177_vm3, %vm176_vm2  ;;  %p362_p6 = scmp.ne.s32.totalorder %s566_s20, %s361_s19  ;;  %s433_s13 = smov [#allocation5]  }
  0x3d   : > { %vm180_vm6 = vmpackc.even %vm179_vm5, %vm178_vm4  ;;  %s365_s23 = sshll.u32 %s433_s13, 4  ;;  %s366_s23 = int_to_ptr.vmem [resolvable:$false] %s365_s23 }
  0x3e   : > { %v181_v6 = vsel %vm180_vm6, 16843009, %v432_v5  ;;  %p363_p12 = pnand %p362_p6, %p622_p11  ;;  %s367_s24 = scalar_lea.vmem %s366_s23, 256 }
  0x3f   : > { %182 = vst [vmem:[%s161_s4] sm:$0xff] %v181_v6  ;;  %p368_p8 = scmp.lt.s32.totalorder %s566_s20, %s366_s23  ;;  %p369_p10 = scmp.lt.s32.totalorder %s367_s24, %s361_s19 }
  0x40   : > { %p364_p13 = pneg %p363_p12 }
  0x41   : > { %p370_p0 = por %p369_p10, %p368_p8 }
  0x43   : > { %p371_p2 = pnand %p370_p0, %p364_p13 }
  0x45   : > { %374 = shalt.err (!%p371_p2)
}
  0x46   : > { %s375_s25 = scalar_lea.hbm %s571_s16, 128  ;;  %s379_s29 = scalar_lea.hbm %s615_s2, 256 }
  0x47   : > { %p376_p4 = scmp.ne.s32.totalorder %s571_s16, %s375_s25  ;;  %p380_p9 = scmp.lt.u32.totalorder %s571_s16, %s615_s2 }
  0x48   : > { %p381_p1 = scmp.lt.u32.totalorder %s379_s29, %s375_s25  ;;  %p383_p6 = scmp.lt.u32.totalorder %s375_s25, %s571_s16 }
  0x49   : > { %p377_p5 = pnand %p376_p4, %p622_p11 }
  0x4a   : > { %p382_p3 = por %p381_p1, %p380_p9 }
  0x4b   : > { %p378_p7 = pneg %p377_p5 }
  0x4c   : > { %p384_p12 = por %p383_p6, %p382_p3 }
  0x4e   : > { %p385_p13 = pnand %p384_p12, %p378_p7 }
  0x50   : > { %388 = shalt.err (!%p385_p13)
}
  0x51   : > { %284 = dma.vmem_to_hbm [thread:$0]  (%p622_p11), %s566_s20, 128, %s571_s16, %s184_s17  }
  0x52 PF: > { %s209_s28 = sand.u32 1, %s415_s9   ;;  %p623_p8 = scmp.ne.s32.totalorder %s620_s22, 0 }
  0x53   : > { %p624_p10 = scmp.ge.s32.totalorder %s427_s12, 2  ;;  %s210_s30 = scalar_lea.sflag [#allocation4], %s209_s28 }
  0x55   : > { %p291_p0 = pnand %p624_p10, %p623_p8 }
  0x57   : > { %410 = dma.done.wait (!%p291_p0), %s210_s30, 128  }
  0x58   : > { %412 = vsyncadd (!%p291_p0), %s210_s30, 4294967168  ;;  %p15_p2 = scmp.ge.s32.totalorder %s474_s15, 4   ;;  %s625_s9 = smov %s419_s10 }
  0x59   : > { %s626_s10 = smov %s423_s11  ;;  %s627_s11 = smov %s486_s18 }
  0x5a   : > { %s628_s12 = smov %s474_s15  ;;  %17 = sbr.rel (!%p15_p2) target bundleno = 5 (0x5), region = 73 }
  0x61   :  { %215 = vsyncpa [#allocation3], 1 }
  0x62   :  { %217 = vsyncpa [#allocation3 + $0x1], 1 }
  0x63   :  { %218 = vsyncpa [#allocation4], 1 }
  0x64   :  { %220 = vsyncpa [#allocation4 + $0x1], 1 }

</bundles_post_ra>
